<compile_context>
chip_gen: v5e
topology: v5e:2x2
jax: 0.10.0
libtpu: 0.0.40
codegen_flags: <defaults>
</compile_context>

<pallas_src>
import math

import jax
import jax.numpy as jnp
from jax.experimental import pallas as pl
from jax.experimental.pallas import tpu as pltpu


# ---------------------------------------------------------------------------
# Kernel
# ---------------------------------------------------------------------------
def _encoder_kernel(xy_ref, w1_ref, b1_ref, w2_ref, b2_ref, w3_ref, b3_ref,
                    out_ref):
    # xy_ref: (TB*N, in_dim) rows of cat([x, y], -1) for TB tasks.
    tb = out_ref.shape[0]
    n_obs = xy_ref.shape[0] // tb
    hidden = w1_ref.shape[1]

    # Layer 1 (single fused matmul) + ReLU.
    h = jnp.dot(xy_ref[...], w1_ref[...], preferred_element_type=jnp.float32)
    h = jnp.maximum(h + b1_ref[...], 0.0)                      # (TB*N, hidden)

    # Per-task mean over the N observations as a sublane reduce (VPU/XLU),
    # not a TB^2-cost pooling matmul.  Because the second Linear is affine,
    # mean_N(h @ w2 + b2) == mean_N(h) @ w2 + b2, so the mean is hoisted.
    pooled = jnp.sum(h.reshape(tb, n_obs, hidden), axis=1) * (1.0 / n_obs)

    rep = jnp.dot(pooled, w2_ref[...],
                  preferred_element_type=jnp.float32) + b2_ref[...]   # (TB, R)
    out = jnp.dot(rep, w3_ref[...],
                  preferred_element_type=jnp.float32) + b3_ref[...]   # (TB, R)
    out_ref[...] = out.astype(out_ref.dtype)


# ---------------------------------------------------------------------------
# VMEM-aware tiling
# ---------------------------------------------------------------------------
def _ceil_to(v, m):
    return -(-int(v) // m) * m


def _lane_pad(d):
    return _ceil_to(max(int(d), 1), 128)


def _sublane_pad(d):
    return _ceil_to(max(int(d), 1), 8)


def _vmem_bytes_per_step(tb, n_obs, in_dim, hidden_dim, rep_dim, in_bytes=4):
    """Rough per-grid-step VMEM estimate.  The dominant term is the hidden
    128-lane padding of the narrow (in_dim-wide) input rows."""
    rows = tb * n_obs
    xy_buf = 2 * rows * _lane_pad(in_dim) * in_bytes          # dbl-buffered in
    h_tmp = rows * _lane_pad(hidden_dim) * 4                  # layer-1 act
    out_buf = 2 * tb * _lane_pad(rep_dim) * 4                 # dbl-buffered out
    weights = 2 * 4 * (_sublane_pad(in_dim) * _lane_pad(hidden_dim)
                       + _sublane_pad(hidden_dim) * _lane_pad(rep_dim)
                       + _sublane_pad(rep_dim) * _lane_pad(rep_dim)
                       + 3 * 8 * _lane_pad(max(hidden_dim, rep_dim)))
    return xy_buf + h_tmp + out_buf + weights


def _device_kind():
    try:
        return jax.devices()[0].device_kind.lower()
    except Exception:  # pragma: no cover - CPU interpret fallback etc.
        return ""


def _choose_tb(batch, n_obs, in_dim, hidden_dim, rep_dim, *, two_cores,
               vmem_budget, in_bytes=4):
    """Pick tasks-per-grid-step (TB) and the resulting number of grid steps.

    Single-TC parts (v5e/v6e): maximize TB (whole batch in one step if it
    fits the VMEM budget) -- extra grid steps are pure overhead there.
    Two-TC parts (v7x): keep >= 2 grid steps so both TensorCores get work,
    budgeting TB against the smaller 64 MiB VMEM.
    """
    def fits(tb):
        return _vmem_bytes_per_step(tb, n_obs, in_dim, hidden_dim, rep_dim,
                                    in_bytes) <= vmem_budget

    # Whole batch in one full-extent block (legal even if batch % 8 != 0).
    if (not two_cores or batch <= 8) and fits(batch):
        # TODO(synk): on v7x with batch <= 8 one TensorCore idles; splitting
        # the grid along N with a partial-sum epilogue would recover it.
        return batch, 1

    # Tiled path: TB must be a multiple of 8 (sublane-legal blocks).
    tb = _ceil_to(batch, 8)
    if two_cores:
        tb = min(tb, _ceil_to(-(-batch // 2), 8))   # >= 2 grid steps
    while tb > 8 and not fits(tb):
        tb -= 8
    n_steps = -(-batch // tb)
    return tb, n_steps


# ---------------------------------------------------------------------------
# Wrapper
# ---------------------------------------------------------------------------
def encoder_forward(support_x, support_y, params, *, use_bf16_inputs=False):
    """Pallas equivalent of Encoder.forward.

    support_x: [B, N, x_dim] f32, support_y: [B, N, y_dim] f32
    params: w1 (x_dim+y_dim, hidden), b1 (1, hidden), w2 (hidden, rep),
            b2 (1, rep), w3 (rep, rep), b3 (1, rep)
    returns: [B, rep] f32
    """
    B, N, x_dim = support_x.shape
    y_dim = support_y.shape[-1]
    in_dim = x_dim + y_dim
    hidden_dim = params["w1"].shape[1]
    rep_dim = params["w2"].shape[1]

    kind = _device_kind()
    two_cores = ("v7" in kind) or ("7x" in kind)
    # Budget against physical VMEM per TensorCore with headroom:
    # v7x has 64 MiB/TC, v5e/v6e have 128 MiB.
    vmem_budget = (48 << 20) if two_cores else (96 << 20)

    in_bytes = 2 if use_bf16_inputs else 4
    tb, n_steps = _choose_tb(B, N, in_dim, hidden_dim, rep_dim,
                             two_cores=two_cores, vmem_budget=vmem_budget,
                             in_bytes=in_bytes)
    bp = tb * n_steps

    # Fuse the concat once in the wrapper (last dim is only in_dim wide, so
    # this is cheap) -> a single input stream / single layer-1 matmul.
    xy = jnp.concatenate([support_x, support_y], axis=-1)     # (B, N, in_dim)
    w1, b1 = params["w1"], params["b1"]
    if use_bf16_inputs:
        # Optional v6e/v7x tweak: halves HBM/VMEM traffic for the big input;
        # accumulation stays f32 via preferred_element_type in the kernel.
        xy = xy.astype(jnp.bfloat16)
        w1 = w1.astype(jnp.bfloat16)
    if bp != B:                                # pad batch to a multiple of TB
        xy = jnp.pad(xy, ((0, bp - B), (0, 0), (0, 0)))
    # Flatten tasks x observations into rows (free, contiguous reshape) so
    # the kernel sees 2-D blocks.
    xy_rows = xy.reshape(bp * N, in_dim)

    est = _vmem_bytes_per_step(tb, N, in_dim, hidden_dim, rep_dim, in_bytes)
    vmem_limit = int(min(vmem_budget, max(2 * est, 16 << 20)))

    if two_cores and n_steps >= 2:
        # Only core-parallel semantics actually shards grid steps across the
        # two v7x TensorCores ("parallel" vs "arbitrary" is ~neutral).
        dim_sem = (getattr(pltpu, "CORE_PARALLEL", "parallel"),)
    else:
        dim_sem = ("parallel",)

    def const_spec(shape):
        return pl.BlockSpec(shape, lambda b: (0,) * len(shape))

    out = pl.pallas_call(
        _encoder_kernel,
        out_shape=jax.ShapeDtypeStruct((bp, rep_dim), jnp.float32),
        grid_spec=pl.GridSpec(
            grid=(n_steps,),
            in_specs=[
                pl.BlockSpec((tb * N, in_dim), lambda b: (b, 0)),
                const_spec((in_dim, hidden_dim)),
                const_spec((1, hidden_dim)),
                const_spec((hidden_dim, rep_dim)),
                const_spec((1, rep_dim)),
                const_spec((rep_dim, rep_dim)),
                const_spec((1, rep_dim)),
            ],
            out_specs=pl.BlockSpec((tb, rep_dim), lambda b: (b, 0)),
        ),
        compiler_params=pltpu.CompilerParams(
            dimension_semantics=dim_sem,
            vmem_limit_bytes=vmem_limit),
    )(xy_rows, w1, b1, params["w2"], params["b2"],
      params["w3"], params["b3"])
    return out[:B]


# ---------------------------------------------------------------------------
# Params / reference
# ---------------------------------------------------------------------------
def init_params(key, input_dim, hidden_dim, rep_dim):
    """Deterministic synthetic init (PyTorch-Linear-style uniform bounds)."""
    ks = jax.random.split(key, 6)

    def lin(kw, kb, fan_in, fan_out):
        bound = 1.0 / math.sqrt(fan_in)
        w = jax.random.uniform(kw, (fan_in, fan_out), jnp.float32,
                               -bound, bound)
        b = jax.random.uniform(kb, (1, fan_out), jnp.float32, -bound, bound)
        return w, b

    w1, b1 = lin(ks[0], ks[1], input_dim, hidden_dim)
    w2, b2 = lin(ks[2], ks[3], hidden_dim, rep_dim)
    w3, b3 = lin(ks[4], ks[5], rep_dim, rep_dim)
    return {"w1": w1, "b1": b1, "w2": w2, "b2": b2, "w3": w3, "b3": b3}


def reference_forward(support_x, support_y, params):
    """Plain-JAX reference matching the PyTorch Encoder semantics."""
    x = jnp.concatenate([support_x, support_y], axis=-1)      # (B, N, in)
    B, N, D = x.shape
    h = x.reshape(-1, D)
    h = jnp.maximum(h @ params["w1"] + params["b1"], 0.0)
    h = h @ params["w2"] + params["b2"]
    h = h.reshape(B, N, -1)
    rep = h.mean(axis=1)
    rep = rep @ params["w3"] + params["b3"]
    return rep


# TODO(synk): CNP's conv image encoders (classes not provided in the spec) and
# the Decoder's softplus/Normal.rsample sampling are outside the Encoder
# forward implemented here.

if __name__ == "__main__":
    # Small shapes consistent with the module's Encoder forward.
    B, N = 16, 16          # task_size, number of observations per task
    x_dim, y_dim = 3, 1    # -> input_dim = 4
    hidden_dim = 32
    rep_dim = 32
    input_dim = x_dim + y_dim

    key = jax.random.PRNGKey(0)
    k_x, k_y, k_p = jax.random.split(key, 3)
    support_x = jax.random.normal(k_x, (B, N, x_dim), jnp.float32)
    support_y = jax.random.normal(k_y, (B, N, y_dim), jnp.float32)
    params = init_params(k_p, input_dim, hidden_dim, rep_dim)

    # jit the wrapper so concat/pad/reshape/slice fuse with the pallas_call.
    fwd = jax.jit(encoder_forward, static_argnames=("use_bf16_inputs",))
    out = jax.block_until_ready(fwd(support_x, support_y, params))

    ref = reference_forward(support_x, support_y, params)
    assert out.shape == (B, rep_dim)
    max_err = jnp.max(jnp.abs(out - ref))
    assert jnp.allclose(out, ref, atol=1e-5, rtol=1e-5), (
        f"mismatch: max abs err = {max_err}")

    print("KERNEL_OK")
</pallas_src>

<mosaic_0001>
module attributes {stable_mosaic.version = 11 : i64} {
  func.func @_encoder_kernel(%arg0: i32, %arg1: memref<256x4xf32, #tpu.memory_space<vmem>>, %arg2: memref<4x32xf32, #tpu.memory_space<vmem>>, %arg3: memref<1x32xf32, #tpu.memory_space<vmem>>, %arg4: memref<32x32xf32, #tpu.memory_space<vmem>>, %arg5: memref<1x32xf32, #tpu.memory_space<vmem>>, %arg6: memref<32x32xf32, #tpu.memory_space<vmem>>, %arg7: memref<1x32xf32, #tpu.memory_space<vmem>>, %arg8: memref<16x32xf32, #tpu.memory_space<vmem>>) attributes {dimension_semantics = [#tpu.dimension_semantics<parallel>], iteration_bounds = array<i64: 1>, scalar_prefetch = 0 : i64, scratch_operands = 0 : i64, tpu.core_type = #tpu.core_type<tc>, window_params = [{transform_indices = @transform_0, window_bounds = array<i64: 256, 4>}, {pipeline_mode = #tpu.pipeline_mode<synchronous>, transform_indices = @transform_1, window_bounds = array<i64: 4, 32>}, {pipeline_mode = #tpu.pipeline_mode<synchronous>, transform_indices = @transform_2, window_bounds = array<i64: 1, 32>}, {pipeline_mode = #tpu.pipeline_mode<synchronous>, transform_indices = @transform_3, window_bounds = array<i64: 32, 32>}, {pipeline_mode = #tpu.pipeline_mode<synchronous>, transform_indices = @transform_4, window_bounds = array<i64: 1, 32>}, {pipeline_mode = #tpu.pipeline_mode<synchronous>, transform_indices = @transform_5, window_bounds = array<i64: 32, 32>}, {pipeline_mode = #tpu.pipeline_mode<synchronous>, transform_indices = @transform_6, window_bounds = array<i64: 1, 32>}, {transform_indices = @transform_7, window_bounds = array<i64: 16, 32>}]} {
    %c0 = arith.constant 0 : index
    %c0_0 = arith.constant 0 : index
    %0 = vector.load %arg1[%c0, %c0_0] : memref<256x4xf32, #tpu.memory_space<vmem>>, vector<256x4xf32>
    %c0_1 = arith.constant 0 : index
    %c0_2 = arith.constant 0 : index
    %1 = vector.load %arg2[%c0_1, %c0_2] : memref<4x32xf32, #tpu.memory_space<vmem>>, vector<4x32xf32>
    %cst = arith.constant dense<0.000000e+00> : vector<256x32xf32>
    %2 = tpu.matmul %0, %1, %cst {dimension_numbers = #tpu.dot_dimension_numbers<[1], [0], [0], [1], [0, 0, 1, 1], [], []>} : vector<256x4xf32>, vector<4x32xf32>, vector<256x32xf32> -> vector<256x32xf32>
    %c0_3 = arith.constant 0 : index
    %c0_4 = arith.constant 0 : index
    %3 = vector.load %arg3[%c0_3, %c0_4] : memref<1x32xf32, #tpu.memory_space<vmem>>, vector<1x32xf32>
    %4 = vector.broadcast %3 : vector<1x32xf32> to vector<256x32xf32>
    %5 = arith.addf %2, %4 : vector<256x32xf32>
    %cst_5 = arith.constant 0.000000e+00 : f32
    %6 = vector.broadcast %cst_5 : f32 to vector<256x32xf32>
    %7 = arith.maximumf %5, %6 : vector<256x32xf32>
    %8 = vector.shape_cast %7 : vector<256x32xf32> to vector<16x16x32xf32>
    %cst_6 = arith.constant dense<0.000000e+00> : vector<16x32xf32>
    %9 = vector.multi_reduction <add>, %8, %cst_6 [1] : vector<16x16x32xf32> to vector<16x32xf32>
    %cst_7 = arith.constant 6.250000e-02 : f32
    %10 = vector.broadcast %cst_7 : f32 to vector<16x32xf32>
    %11 = arith.mulf %9, %10 : vector<16x32xf32>
    %c0_8 = arith.constant 0 : index
    %c0_9 = arith.constant 0 : index
    %12 = vector.load %arg4[%c0_8, %c0_9] : memref<32x32xf32, #tpu.memory_space<vmem>>, vector<32x32xf32>
    %cst_10 = arith.constant dense<0.000000e+00> : vector<16x32xf32>
    %13 = tpu.matmul %11, %12, %cst_10 {dimension_numbers = #tpu.dot_dimension_numbers<[1], [0], [0], [1], [0, 0, 1, 1], [], []>} : vector<16x32xf32>, vector<32x32xf32>, vector<16x32xf32> -> vector<16x32xf32>
    %c0_11 = arith.constant 0 : index
    %c0_12 = arith.constant 0 : index
    %14 = vector.load %arg5[%c0_11, %c0_12] : memref<1x32xf32, #tpu.memory_space<vmem>>, vector<1x32xf32>
    %15 = vector.broadcast %14 : vector<1x32xf32> to vector<16x32xf32>
    %16 = arith.addf %13, %15 : vector<16x32xf32>
    %c0_13 = arith.constant 0 : index
    %c0_14 = arith.constant 0 : index
    %17 = vector.load %arg6[%c0_13, %c0_14] : memref<32x32xf32, #tpu.memory_space<vmem>>, vector<32x32xf32>
    %cst_15 = arith.constant dense<0.000000e+00> : vector<16x32xf32>
    %18 = tpu.matmul %16, %17, %cst_15 {dimension_numbers = #tpu.dot_dimension_numbers<[1], [0], [0], [1], [0, 0, 1, 1], [], []>} : vector<16x32xf32>, vector<32x32xf32>, vector<16x32xf32> -> vector<16x32xf32>
    %c0_16 = arith.constant 0 : index
    %c0_17 = arith.constant 0 : index
    %19 = vector.load %arg7[%c0_16, %c0_17] : memref<1x32xf32, #tpu.memory_space<vmem>>, vector<1x32xf32>
    %20 = vector.broadcast %19 : vector<1x32xf32> to vector<16x32xf32>
    %21 = arith.addf %18, %20 : vector<16x32xf32>
    %c0_18 = arith.constant 0 : index
    %c0_19 = arith.constant 0 : index
    %22 = vector.load %arg8[%c0_18, %c0_19] : memref<16x32xf32, #tpu.memory_space<vmem>>, vector<16x32xf32>
    tpu.vector_store %arg8[%c0_18, %c0_19], %21 {strides = array<i32>} : memref<16x32xf32, #tpu.memory_space<vmem>>, vector<16x32xf32>,
    return
  }
  func.func @transform_0(%arg0: i32) -> (i32, i32) {
    %c0_i32 = arith.constant 0 : i32
    %c0_i32_0 = arith.constant 0 : i32
    return %arg0, %c0_i32 : i32, i32
  }
  func.func @transform_1(%arg0: i32) -> (i32, i32) {
    %c0_i32 = arith.constant 0 : i32
    %c0_i32_0 = arith.constant 0 : i32
    %c0_i32_1 = arith.constant 0 : i32
    return %c0_i32, %c0_i32_0 : i32, i32
  }
  func.func @transform_2(%arg0: i32) -> (i32, i32) {
    %c0_i32 = arith.constant 0 : i32
    %c0_i32_0 = arith.constant 0 : i32
    %c0_i32_1 = arith.constant 0 : i32
    return %c0_i32, %c0_i32_0 : i32, i32
  }
  func.func @transform_3(%arg0: i32) -> (i32, i32) {
    %c0_i32 = arith.constant 0 : i32
    %c0_i32_0 = arith.constant 0 : i32
    %c0_i32_1 = arith.constant 0 : i32
    return %c0_i32, %c0_i32_0 : i32, i32
  }
  func.func @transform_4(%arg0: i32) -> (i32, i32) {
    %c0_i32 = arith.constant 0 : i32
    %c0_i32_0 = arith.constant 0 : i32
    %c0_i32_1 = arith.constant 0 : i32
    return %c0_i32, %c0_i32_0 : i32, i32
  }
  func.func @transform_5(%arg0: i32) -> (i32, i32) {
    %c0_i32 = arith.constant 0 : i32
    %c0_i32_0 = arith.constant 0 : i32
    %c0_i32_1 = arith.constant 0 : i32
    return %c0_i32, %c0_i32_0 : i32, i32
  }
  func.func @transform_6(%arg0: i32) -> (i32, i32) {
    %c0_i32 = arith.constant 0 : i32
    %c0_i32_0 = arith.constant 0 : i32
    %c0_i32_1 = arith.constant 0 : i32
    return %c0_i32, %c0_i32_0 : i32, i32
  }
  func.func @transform_7(%arg0: i32) -> (i32, i32) {
    %c0_i32 = arith.constant 0 : i32
    %c0_i32_0 = arith.constant 0 : i32
    return %arg0, %c0_i32 : i32, i32
  }
}

</mosaic_0001>

<bundles_post_ra>
// kernel: encoder_forward.1
= control target key start
LH: loop header
LB: loop body
LE: loop exit
PB: predicated region body
PF: predicated region fallthrough
CT: control target
= control target key end

     0   :  { %vm161_vm0 = vcmask 1043456   ;;  %vm64_vm1 = vcmask 31744   ;;  %s987_s0 = inlined_call_operand.vmem [shape: f32[256,4], index: 0, kind: input, shape index: {}]   ;;  %s988_s1 = inlined_call_operand.vmem [shape: f32[4,32], index: 1, kind: input, shape index: {}]   ;;  %s989_s2 = inlined_call_operand.vmem [shape: f32[1,32], index: 2, kind: input, shape index: {}]   ;;  %s990_s3 = inlined_call_operand.vmem [shape: f32[32,32], index: 3, kind: input, shape index: {}]   ;;  %s991_s4 = inlined_call_operand.vmem [shape: f32[1,32], index: 4, kind: input, shape index: {}]   ;;  %s992_s5 = inlined_call_operand.vmem [shape: f32[32,32], index: 5, kind: input, shape index: {}]   ;;  %s993_s6 = inlined_call_operand.vmem [shape: f32[1,32], index: 6, kind: input, shape index: {}]   ;;  %s994_s7 = inlined_call_operand.hbm [shape: f32[16,32], index: 7, kind: output, shape index: {}]  }
   0x1   :  { %v59_v0 = vld [vmem:[%s988_s1] sm:$0xf]  ;;  %v50_v3 = vld [vmem:[%s987_s0 + $0xb8] sm:$0xff]  ;;  %v36_v4 = vld [vmem:[%s987_s0 + $0x48] sm:$0xff] }
   0x2   :  { %v27_v1 = vld [vmem:[%s987_s0] sm:$0xff]  ;;  %600 = vmatpush.msk.msra.mxu0 %vm161_vm0, %v59_v0  ;;  %638 = vmatpush.msk.msra.mxu2 %vm161_vm0, %v59_v0  ;;  %v28_v5 = vld [vmem:[%s987_s0 + $0x8] sm:$0xff] }
   0x3   :  { %v43_v2 = vld [vmem:[%s987_s0 + $0x80] sm:$0xff]  ;;  %639 = vmatpush.msk.msra.mxu3 %vm161_vm0, %v59_v0  ;;  %601 = vmatmul.msk.f32.vlgmr.msra.gmra.mxu0 %vm64_vm1, %v27_v1  ;;  %v44_v6 = vld [vmem:[%s987_s0 + $0x88] sm:$0xff] }
   0x4   :  { %617 = vmatmul.msk.f32.vlgmr.msra.gmra.mxu2 %vm64_vm1, %v43_v2  ;;  %624 = vmatmul.msk.f32.vlgmr.msra.gmra.mxu3 %vm64_vm1, %v50_v3  ;;  %v51_v7 = vld [vmem:[%s987_s0 + $0xc0] sm:$0xff] }
   0x5   :  { %637 = vmatpush.msk.msra.mxu1 %vm161_vm0, %v59_v0 }
   0x6   :  { %610 = vmatmul.msk.f32.vlgmr.msra.gmra.mxu1 %vm64_vm1, %v36_v4 }
   0x7   :  { %12 = vsyncpa [#allocation3], 0  ;;  %v37_v8 = vld [vmem:[%s987_s0 + $0x50] sm:$0xff]  ;;  %v52_v11 = vld [vmem:[%s987_s0 + $0xc8] sm:$0xff]  ;;  %vm310_vm2 = vcmask 261120   ;;  %vm495_vm3 = vcmask 1041409  }
   0x8   :  { %v29_v9 = vld [vmem:[%s987_s0 + $0x10] sm:$0xff]  ;;  %v38_v12 = vld [vmem:[%s987_s0 + $0x58] sm:$0xff]  ;;  %v39_v16 = vld [vmem:[%s987_s0 + $0x60] sm:$0xff]  ;;  %vm497_vm4 = vcmask 1042434   ;;  %vm499_vm5 = vcmask 1043459   ;;  %vm501_vm6 = vcmask 1044484  }
   0x9   :  { %v45_v10 = vld [vmem:[%s987_s0 + $0x90] sm:$0xff]  ;;  %v30_v13 = vld [vmem:[%s987_s0 + $0x18] sm:$0xff]  ;;  %v31_v17 = vld [vmem:[%s987_s0 + $0x20] sm:$0xff]  ;;  %vm503_vm7 = vcmask 1045509   ;;  %vm505_vm8 = vcmask 1046534   ;;  %vm507_vm9 = vcmask 1047559  }
   0xa   :  { %v46_v14 = vld [vmem:[%s987_s0 + $0x98] sm:$0xff]  ;;  %v53_v15 = vld [vmem:[%s987_s0 + $0xd0] sm:$0xff]  ;;  %v47_v18 = vld [vmem:[%s987_s0 + $0xa0] sm:$0xff]  ;;  %s672_s12 = smov [#allocation2]   ;;  %s588_s15 = sshll.u32 %s994_s7, 4  ;;  %s589_s15 = int_to_ptr.hbm [resolvable:$true] %s588_s15 }
   0xb   :  { %602 = vmatmul.msk.f32.gmra.mxu0 %vm64_vm1, %v28_v5  ;;  %v54_v19 = vld [vmem:[%s987_s0 + $0xd8] sm:$0xff]  ;;  %v40_v20 = vld [vmem:[%s987_s0 + $0x68] sm:$0xff]  ;;  %v55_v23 = vld [vmem:[%s987_s0 + $0xe0] sm:$0xff]  ;;  %s586_s13 = sshll.u32 %s672_s12, 4  ;;  %s673_s16 = smov 128   ;;  %s587_s13 = int_to_ptr.vmem [resolvable:$true] %s586_s13 }
   0xc   :  { %618 = vmatmul.msk.f32.gmra.mxu2 %vm64_vm1, %v44_v6  ;;  %625 = vmatmul.msk.f32.gmra.mxu3 %vm64_vm1, %v51_v7  ;;  %v32_v21 = vld [vmem:[%s987_s0 + $0x28] sm:$0xff]  ;;  %v41_v24 = vld [vmem:[%s987_s0 + $0x70] sm:$0xff]  ;;  %v42_v28 = vld [vmem:[%s987_s0 + $0x78] sm:$0xff]  ;;  %s674_s17 = smov 8  }
   0xd   :  { %v48_v22 = vld [vmem:[%s987_s0 + $0xa8] sm:$0xff]  ;;  %v33_v25 = vld [vmem:[%s987_s0 + $0x30] sm:$0xff]  ;;  %v34_v29 = vld [vmem:[%s987_s0 + $0x38] sm:$0xff] }
   0xe   :  { %611 = vmatmul.msk.f32.gmra.mxu1 %vm64_vm1, %v37_v8  ;;  %v49_v26 = vld [vmem:[%s987_s0 + $0xb0] sm:$0xff]  ;;  %v56_v27 = vld [vmem:[%s987_s0 + $0xe8] sm:$0xff]  ;;  %v35_v31 = vld [vmem:[%s987_s0 + $0x40] sm:$0xff] }
   0xf   :  { %v57_v30 = vld [vmem:[%s987_s0 + $0xf0] sm:$0xff]  ;;  %v58_v32 = vld [vmem:[%s987_s0 + $0xf8] sm:$0xff]  ;;  %v849_v35 = vld [vmem:[%s989_s2] ss:$0 sm:$0xff] }
  0x10   :  { %v474_v53 = vld [vmem:[%s990_s3 + $0x18] sm:$0xff] }
  0x11   :  { %532 = vmatpush.msrb.mxu1 %v474_v53 }
  0x13   :  { %603 = vmatmul.msk.f32.gmra.mxu0 %vm64_vm1, %v29_v9 }
  0x14   :  { %619 = vmatmul.msk.f32.gmra.mxu2 %vm64_vm1, %v45_v10  ;;  %626 = vmatmul.msk.f32.gmra.mxu3 %vm64_vm1, %v52_v11 }
  0x16   :  { %612 = vmatmul.msk.f32.gmra.mxu1 %vm64_vm1, %v38_v12 }
  0x1b   :  { %604 = vmatmul.msk.f32.gmra.mxu0 %vm64_vm1, %v30_v13 }
  0x1c   :  { %620 = vmatmul.msk.f32.gmra.mxu2 %vm64_vm1, %v46_v14  ;;  %627 = vmatmul.msk.f32.gmra.mxu3 %vm64_vm1, %v53_v15 }
  0x1e   :  { %613 = vmatmul.msk.f32.gmra.mxu1 %vm64_vm1, %v39_v16 }
  0x23   :  { %605 = vmatmul.msk.f32.gmra.mxu0 %vm64_vm1, %v31_v17  ;;  %v473_v17 = vld [vmem:[%s990_s3 + $0x10] sm:$0xff] }
  0x24   :  { %621 = vmatmul.msk.f32.gmra.mxu2 %vm64_vm1, %v47_v18  ;;  %628 = vmatmul.msk.f32.gmra.mxu3 %vm64_vm1, %v54_v19 }
  0x25   :  { %533 = vmatpush.msrb.mxu1 %v473_v17 }
  0x26   :  { %614 = vmatmul.msk.f32.gmra.mxu1 %vm64_vm1, %v40_v20 }
  0x2b   :  { %606 = vmatmul.msk.f32.gmra.mxu0 %vm64_vm1, %v32_v21 }
  0x2c   :  { %622 = vmatmul.msk.f32.gmra.mxu2 %vm64_vm1, %v48_v22  ;;  %629 = vmatmul.msk.f32.gmra.mxu3 %vm64_vm1, %v55_v23 }
  0x2e   :  { %615 = vmatmul.msk.f32.gmra.mxu1 %vm64_vm1, %v41_v24 }
  0x33   :  { %607 = vmatmul.msk.f32.gmra.mxu0 %vm64_vm1, %v33_v25 }
  0x34   :  { %623 = vmatmul.msk.f32.gmra.mxu2 %vm64_vm1, %v49_v26  ;;  %630 = vmatmul.msk.f32.gmra.mxu3 %vm64_vm1, %v56_v27 }
  0x36   :  { %616 = vmatmul.msk.f32.gmra.mxu1 %vm64_vm1, %v42_v28 }
  0x3b   :  { %608 = vmatmul.msk.f32.gmra.mxu0 %vm64_vm1, %v34_v29 }
  0x3c   :  { %631 = vmatmul.msk.f32.gmra.mxu3 %vm64_vm1, %v57_v30 }
  0x43   :  { %609 = vmatmul.msk.f32.gmra.mxu0 %vm64_vm1, %v35_v31 }
  0x44   :  { %632 = vmatmul.msk.f32.gmra.mxu3 %vm64_vm1, %v58_v32 }
  0x80   :  { %v182_v33 = vpop.f32.mrf.mxu0 }
  0x81   :  { %v183_v40 = vadd.f32 %v849_v35, %v182_v33 }
  0x83   :  { %v209_v34 = vpop.f32.mrf.mxu1  ;;  %v278_v43 = vmax.f32 %v183_v40, 0.0 }
  0x84   :  { %v210_v20 = vadd.f32 %v849_v35, %v209_v34 }
  0x85   :  { %v311_v48 = vsel %vm310_vm2, %v278_v43, 0.0 }
  0x86   :  { %v287_v33 = vmax.f32 %v210_v20, 0.0 }
  0x87   :  { %v230_v36 = vpop.f32.mrf.mxu2  ;;  %v251_v37 = vpop.f32.mrf.mxu3 }
  0x88   :  { %v185_v38 = vpop.f32.mrf.mxu0  ;;  %v231_v49 = vadd.f32 %v849_v35, %v230_v36  ;;  %v252_v23 = vadd.f32 %v849_v35, %v251_v37 }
  0x89   :  { %v186_v39 = vadd.f32 %v849_v35, %v185_v38 }
  0x8a   :  { %v294_v54 = vmax.f32 %v231_v49, 0.0 }
  0x8b   :  { %v212_v41 = vpop.f32.mrf.mxu1  ;;  %v279_v42 = vmax.f32 %v186_v39, 0.0  ;;  %v301_v39 = vmax.f32 %v252_v23, 0.0 }
  0x8c   :  { %v383_v60 = vsel %vm310_vm2, %v294_v54, 0.0  ;;  %v213_v61 = vadd.f32 %v849_v35, %v212_v41  ;;  %v888_v54 = vsel %vm310_vm2, %v287_v33, 0.0 }
  0x8d   :  { %v312_v46 = vsel %vm310_vm2, %v279_v42, 0.0 }
  0x8e   :  { %v313_v51 = vadd.f32 %v312_v46, %v311_v48  ;;  %v288_v3 = vmax.f32 %v213_v61, 0.0 }
  0x8f   :  { %v233_v44 = vpop.f32.mrf.mxu2  ;;  %v254_v45 = vpop.f32.mrf.mxu3 }
  0x90   :  { %v188_v47 = vpop.f32.mrf.mxu0  ;;  %v234_v50 = vadd.f32 %v849_v35, %v233_v44  ;;  %v314_v56 = vrot.slane %v313_v51, 4  ;;  %v356_v11 = vsel %vm310_vm2, %v288_v3, 0.0  ;;  %v255_v18 = vadd.f32 %v849_v35, %v254_v45 }
  0x91   :  { %v189_v12 = vadd.f32 %v849_v35, %v188_v47 }
  0x92   :  { %v295_v55 = vmax.f32 %v234_v50, 0.0  ;;  %v315_v0 = vadd.f32 %v314_v56, %v313_v51  ;;  %v302_v29 = vmax.f32 %v255_v18, 0.0 }
  0x93   :  { %v215_v52 = vpop.f32.mrf.mxu1  ;;  %v280_v24 = vmax.f32 %v189_v12, 0.0 }
  0x94   :  { %v384_v62 = vsel %vm310_vm2, %v295_v55, 0.0  ;;  %v216_v63 = vadd.f32 %v849_v35, %v215_v52  ;;  %v316_v5 = vrot.slane %v315_v0, 2  ;;  %v419_v47 = vsel %vm310_vm2, %v302_v29, 0.0 }
  0x95   :  { %v385_v2 = vadd.f32 %v384_v62, %v383_v60  ;;  %v320_v40 = vsel %vm310_vm2, %v280_v24, 0.0  ;;  %v891_v55 = vsel %vm310_vm2, %v301_v39, 0.0 }
  0x96   :  { %v289_v4 = vmax.f32 %v216_v63, 0.0  ;;  %v317_v15 = vadd.f32 %v316_v5, %v315_v0 }
  0x97   :  { %v236_v57 = vpop.f32.mrf.mxu2  ;;  %v257_v58 = vpop.f32.mrf.mxu3  ;;  %v386_v10 = vrot.slane %v385_v2, 4 }
  0x98   :  { %v191_v59 = vpop.f32.mrf.mxu0  ;;  %v357_v13 = vsel %vm310_vm2, %v289_v4, 0.0  ;;  %v258_v14 = vadd.f32 %v849_v35, %v257_v58  ;;  %v318_v26 = vrot.slane %v317_v15, 1  ;;  %v237_v30 = vadd.f32 %v849_v35, %v236_v57  ;;  %v472_v58 = vld [vmem:[%s990_s3 + $0x8] sm:$0xff] }
  0x99   :  { %v192_v8 = vadd.f32 %v849_v35, %v191_v59  ;;  %v387_v21 = vadd.f32 %v386_v10, %v385_v2  ;;  %v358_v22 = vadd.f32 %v357_v13, %v356_v11  ;;  %534 = vmatpush.msrb.mxu1 %v472_v58 }
  0x9a   :  { %v303_v25 = vmax.f32 %v258_v14, 0.0  ;;  %v319_v42 = vadd.f32 %v318_v26, %v317_v15  ;;  %v296_v48 = vmax.f32 %v237_v30, 0.0 }
  0x9b   :  { %v218_v1 = vpop.f32.mrf.mxu1  ;;  %v281_v19 = vmax.f32 %v192_v8, 0.0  ;;  %v388_v36 = vrot.slane %v387_v21, 2  ;;  %v359_v38 = vrot.slane %v358_v22, 4 }
  0x9c   :  { %v420_v37 = vsel %vm310_vm2, %v303_v25, 0.0  ;;  %v219_v44 = vadd.f32 %v849_v35, %v218_v1  ;;  %v897_v59 = vmul.f32 0.0625, %v319_v42  ;;  %v392_v1 = vsel %vm310_vm2, %v296_v48, 0.0 }
  0x9d   :  { %v321_v31 = vsel %vm310_vm2, %v281_v19, 0.0  ;;  %v389_v50 = vadd.f32 %v388_v36, %v387_v21  ;;  %v360_v51 = vadd.f32 %v359_v38, %v358_v22  ;;  %v421_v52 = vadd.f32 %v420_v37, %v419_v47 }
  0x9e   :  { %v322_v43 = vadd.f32 %v321_v31, %v320_v40  ;;  %v290_v61 = vmax.f32 %v219_v44, 0.0 }
  0x9f   :  { %v239_v6 = vpop.f32.mrf.mxu2  ;;  %v864_v7 = vpop.f32.mrf.mxu3  ;;  %v361_v8 = vrot.slane %v360_v51, 2 }
  0xa0   :  { %v194_v9 = vpop.f32.mrf.mxu0  ;;  %v240_v34 = vadd.f32 %v849_v35, %v239_v6  ;;  %v323_v60 = vrot.slane %v322_v43, 4  ;;  %v390_v6 = vrot.slane %v389_v50, 1  ;;  %v261_v17 = vadd.f32 %v849_v35, %v864_v7 }
  0xa1   :  { %v195_v45 = vadd.f32 %v849_v35, %v194_v9  ;;  %v422_v9 = vrot.slane %v421_v52, 4  ;;  %v362_v25 = vadd.f32 %v361_v8, %v360_v51 }
  0xa2   :  { %v297_v53 = vmax.f32 %v240_v34, 0.0  ;;  %v324_v15 = vadd.f32 %v323_v60, %v322_v43  ;;  %v391_v24 = vadd.f32 %v390_v6, %v389_v50  ;;  %v304_v33 = vmax.f32 %v261_v17, 0.0 }
  0xa3   :  { %v221_v16 = vpop.f32.mrf.mxu1  ;;  %v282_v62 = vmax.f32 %v195_v45, 0.0  ;;  %v915_v29 = vadd.f32 %v422_v9, %v421_v52 }
  0xa4   :  { %v222_v56 = vadd.f32 %v849_v35, %v221_v16  ;;  %v393_v10 = vsel %vm310_vm2, %v297_v53, 0.0  ;;  %v365_v16 = vsel %vm310_vm2, %v290_v61, 0.0  ;;  %v924_v48 = vmul.f32 0.0625, %v391_v24 }
  0xa5   :  { %v329_v18 = vsel %vm310_vm2, %v282_v62, 0.0  ;;  %v394_v26 = vadd.f32 %v393_v10, %v392_v1  ;;  %v428_v60 = vsel %vm310_vm2, %v304_v33, 0.0 }
  0xa6   :  { %v291_v11 = vmax.f32 %v222_v56, 0.0 }
  0xa7   :  { %v242_v27 = vpop.f32.mrf.mxu2  ;;  %v263_v28 = vpop.f32.mrf.mxu3  ;;  %v395_v44 = vrot.slane %v394_v26, 4 }
  0xa8   :  { %v197_v32 = vpop.f32.mrf.mxu0  ;;  %v243_v49 = vadd.f32 %v849_v35, %v242_v27  ;;  %v264_v12 = vadd.f32 %v849_v35, %v263_v28  ;;  %v471_v28 = vld [vmem:[%s990_s3] sm:$0xff]  ;;  %v366_v7 = vsel %vm310_vm2, %v291_v11, 0.0 }
  0xa9   :  { %v198_v41 = vadd.f32 %v849_v35, %v197_v32  ;;  %535 = vmatpush.msrb.mxu1 %v471_v28  ;;  %v325_v32 = vrot.slane %v324_v15, 2  ;;  %v367_v45 = vadd.f32 %v366_v7, %v365_v16 }
  0xaa   :  { %v298_v2 = vmax.f32 %v243_v49, 0.0  ;;  %v305_v30 = vmax.f32 %v264_v12, 0.0 }
  0xab   :  { %v224_v46 = vpop.f32.mrf.mxu1  ;;  %v283_v57 = vmax.f32 %v198_v41, 0.0  ;;  %v326_v58 = vadd.f32 %v325_v32, %v324_v15  ;;  %v368_v1 = vrot.slane %v367_v45, 4 }
  0xac   :  { %v225_v3 = vadd.f32 %v849_v35, %v224_v46  ;;  %v401_v20 = vsel %vm310_vm2, %v298_v2, 0.0  ;;  %v429_v49 = vsel %vm310_vm2, %v305_v30, 0.0  ;;  %v546_v30 = vld [vmem:[%s992_s5 + $0x18] sm:$0xff] }
  0xad   :  { %v330_v13 = vsel %vm310_vm2, %v283_v57, 0.0  ;;  %569 = vmatpush.msrb.mxu2 %v546_v30 }
  0xae   :  { %v292_v21 = vmax.f32 %v225_v3, 0.0  ;;  %v331_v27 = vadd.f32 %v330_v13, %v329_v18  ;;  %v424_v13 = vrot.slane %v915_v29, 2 }
  0xaf   :  { %v245_v63 = vpop.f32.mrf.mxu2  ;;  %v266_v0 = vpop.f32.mrf.mxu3 }
  0xb0   :  { %v246_v4 = vadd.f32 %v849_v35, %v245_v63  ;;  %v200_v5 = vpop.f32.mrf.mxu0  ;;  %v374_v40 = vsel %vm310_vm2, %v292_v21, 0.0  ;;  %v332_v46 = vrot.slane %v331_v27, 4  ;;  %v267_v50 = vadd.f32 %v849_v35, %v266_v0 }
  0xb1   :  { %v201_v38 = vadd.f32 %v849_v35, %v200_v5  ;;  %v396_v63 = vadd.f32 %v395_v44, %v394_v26  ;;  %v430_v5 = vadd.f32 %v429_v49, %v428_v60 }
  0xb2   :  { %v299_v14 = vmax.f32 %v246_v4, 0.0  ;;  %v333_v2 = vadd.f32 %v332_v46, %v331_v27  ;;  %v363_v4 = vrot.slane %v362_v25, 1  ;;  %v306_v6 = vmax.f32 %v267_v50, 0.0  ;;  %v543_v50 = vld [vmem:[%s992_s5] sm:$0xff] }
  0xb3   :  { %v227_v19 = vpop.f32.mrf.mxu1  ;;  %v284_v53 = vmax.f32 %v201_v38, 0.0  ;;  %v397_v18 = vrot.slane %v396_v63, 2  ;;  %v431_v21 = vrot.slane %v430_v5, 4 }
  0xb4   :  { %v402_v22 = vsel %vm310_vm2, %v299_v14, 0.0  ;;  %v228_v23 = vadd.f32 %v849_v35, %v227_v19  ;;  %v327_v14 = vrot.slane %v326_v58, 1  ;;  %v334_v19 = vrot.slane %v333_v2, 2 }
  0xb5   :  { %v403_v36 = vadd.f32 %v402_v22, %v401_v20  ;;  %v338_v9 = vsel %vm310_vm2, %v284_v53, 0.0  ;;  %v437_v22 = vsel %vm310_vm2, %v306_v6, 0.0  ;;  %v364_v26 = vadd.f32 %v363_v4, %v362_v25 }
  0xb6   :  { %v293_v31 = vmax.f32 %v228_v23, 0.0  ;;  %v328_v25 = vadd.f32 %v327_v14, %v326_v58 }
  0xb7   :  { %v248_v34 = vpop.f32.mrf.mxu2  ;;  %v269_v39 = vpop.f32.mrf.mxu3  ;;  %v404_v52 = vrot.slane %v403_v36, 4 }
  0xb8   :  { %v375_v37 = vsel %vm310_vm2, %v293_v31, 0.0  ;;  %v249_v41 = vadd.f32 %v849_v35, %v248_v34  ;;  %v270_v42 = vadd.f32 %v849_v35, %v269_v39  ;;  %v203_v43 = vpop.f32.mrf.mxu0  ;;  %v545_v31 = vld [vmem:[%s992_s5 + $0x10] sm:$0xff]  ;;  %v425_v34 = vadd.f32 %v424_v13, %v915_v29 }
  0xb9   :  { %v204_v47 = vadd.f32 %v849_v35, %v203_v43  ;;  %v376_v56 = vadd.f32 %v375_v37, %v374_v40  ;;  %v405_v8 = vadd.f32 %v404_v52, %v403_v36  ;;  %v398_v39 = vadd.f32 %v397_v18, %v396_v63  ;;  %v544_v37 = vld [vmem:[%s992_s5 + $0x8] sm:$0xff]  ;;  %570 = vmatpush.msrb.mxu2 %v545_v31 }
  0xba   :  { %v300_v51 = vmax.f32 %v249_v41, 0.0  ;;  %v307_v62 = vmax.f32 %v270_v42, 0.0  ;;  %v335_v40 = vadd.f32 %v334_v19, %v333_v2  ;;  %v432_v42 = vadd.f32 %v431_v21, %v430_v5 }
  0xbb   :  { %v285_v57 = vmax.f32 %v204_v47, 0.0  ;;  %v377_v10 = vrot.slane %v376_v56, 4  ;;  %v406_v27 = vrot.slane %v405_v8, 2  ;;  %571 = vmatpush.msrb.mxu2 %v544_v37  ;;  %v399_v58 = vrot.slane %v398_v39, 1 }
  0xbc   :  { %v410_v61 = vsel %vm310_vm2, %v300_v51, 0.0  ;;  %v438_v15 = vsel %vm310_vm2, %v307_v62, 0.0  ;;  %v336_v60 = vrot.slane %v335_v40, 1  ;;  %v456_v62 = vmul.f32 0.0625, %v328_v25 }
  0xbd   :  { %v412_v3 = vadd.f32 %v891_v55, %v410_v61  ;;  %v339_v0 = vsel %vm310_vm2, %v285_v57, 0.0  ;;  %v369_v55 = vadd.f32 %v368_v1, %v367_v45  ;;  %v378_v28 = vadd.f32 %v377_v10, %v376_v56  ;;  %572 = vmatpush.msrb.mxu2 %v543_v50 }
  0xbe   :  { %v340_v16 = vadd.f32 %v339_v0, %v338_v9  ;;  %v439_v7 = vadd.f32 %v438_v15, %v437_v22  ;;  %v407_v45 = vadd.f32 %v406_v27, %v405_v8  ;;  %v426_v57 = vrot.slane %v425_v34, 1 }
  0xbf   :  { %v413_v11 = vrot.slane %v412_v3, 4  ;;  %v272_v12 = vpop.f32.mrf.mxu3  ;;  %v370_v41 = vrot.slane %v369_v55, 2  ;;  %v379_v46 = vrot.slane %v378_v28, 2  ;;  %v400_v9 = vadd.f32 %v399_v58, %v398_v39 }
  0xc0   :  { %v206_v17 = vpop.f32.mrf.mxu0  ;;  %v341_v23 = vrot.slane %v340_v16, 4  ;;  %v273_v36 = vadd.f32 %v849_v35, %v272_v12  ;;  %v440_v47 = vrot.slane %v439_v7, 4  ;;  %v337_v10 = vadd.f32 %v336_v60, %v335_v40 }
  0xc1   :  { %v414_v20 = vadd.f32 %v413_v11, %v412_v3  ;;  %v207_v24 = vadd.f32 %v849_v35, %v206_v17  ;;  %v371_v63 = vadd.f32 %v370_v41, %v369_v55  ;;  %v408_v3 = vrot.slane %v407_v45, 1 }
  0xc2   :  { %v342_v33 = vadd.f32 %v341_v23, %v340_v16  ;;  %v308_v53 = vmax.f32 %v273_v36, 0.0  ;;  %v441_v4 = vadd.f32 %v440_v47, %v439_v7  ;;  %v380_v6 = vadd.f32 %v379_v46, %v378_v28 }
  0xc3   :  { %v415_v32 = vrot.slane %v414_v20, 2  ;;  %v286_v38 = vmax.f32 %v207_v24, 0.0  ;;  %v460_v13 = vmul.f32 0.0625, %v364_v26  ;;  %v427_v14 = vadd.f32 %v426_v57, %v425_v34 }
  0xc4   :  { %v343_v43 = vrot.slane %v342_v33, 2  ;;  %v446_v8 = vsel %vm310_vm2, %v308_v53, 0.0  ;;  %v372_v15 = vrot.slane %v371_v63, 1  ;;  %v409_v17 = vadd.f32 %v408_v3, %v407_v45 }
  0xc5   :  { %v347_v44 = vsel %vm310_vm2, %v286_v38, 0.0  ;;  %v416_v51 = vadd.f32 %v415_v32, %v414_v20  ;;  %v442_v18 = vrot.slane %v441_v4, 2  ;;  %v496_v20 = vsel %vm495_vm3, %v456_v62, %v897_v59 }
  0xc6   :  { %v349_v49 = vadd.f32 %v888_v54, %v347_v44  ;;  %v344_v52 = vadd.f32 %v343_v43, %v342_v33  ;;  %v433_v54 = vrot.slane %v432_v42, 2  ;;  %v381_v22 = vrot.slane %v380_v6, 1 }
  0xc7   :  { %v275_v29 = vpop.f32.mrf.mxu3  ;;  %v417_v0 = vrot.slane %v416_v51, 1  ;;  %v464_v24 = vmul.f32 0.0625, %v400_v9  ;;  %v457_v27 = vmul.f32 0.0625, %v337_v10  ;;  %v373_v30 = vadd.f32 %v372_v15, %v371_v63 }
  0xc8   :  { %v276_v56 = vadd.f32 %v849_v35, %v275_v29  ;;  %v350_v61 = vrot.slane %v349_v49, 4  ;;  %v345_v1 = vrot.slane %v344_v52, 1  ;;  %v434_v21 = vadd.f32 %v433_v54, %v432_v42 }
  0xc9   :  { %v418_v23 = vadd.f32 %v417_v0, %v416_v51  ;;  %v465_v26 = vmul.f32 0.0625, %v409_v17  ;;  %v443_v32 = vadd.f32 %v442_v18, %v441_v4  ;;  %v382_v25 = vadd.f32 %v381_v22, %v380_v6  ;;  %v645_v6 = vld [vmem:[%s993_s6] ss:$0 sm:$0xff] }
  0xca   :  { %v309_v2 = vmax.f32 %v276_v56, 0.0  ;;  %v351_v5 = vadd.f32 %v350_v61, %v349_v49  ;;  %v346_v16 = vadd.f32 %v345_v1, %v344_v52  ;;  %v435_v38 = vrot.slane %v434_v21, 1 }
  0xcb   :  { %v466_v34 = vmul.f32 0.0625, %v418_v23  ;;  %v509_v59 = vsel %vm495_vm3, %v464_v24, %v924_v48  ;;  %v498_v37 = vsel %vm497_vm4, %v457_v27, %v496_v20  ;;  %v461_v41 = vmul.f32 0.0625, %v373_v30 }
  0xcc   :  { %v447_v35 = vsel %vm310_vm2, %v309_v2, 0.0  ;;  %v352_v11 = vrot.slane %v351_v5, 2  ;;  %v458_v31 = vmul.f32 0.0625, %v346_v16  ;;  %v444_v43 = vrot.slane %v443_v32, 1  ;;  %v644_v2 = vld [vmem:[%s991_s4] ss:$0 sm:$0xff] }
  0xcd   :  { %v448_v12 = vadd.f32 %v447_v35, %v446_v8  ;;  %v510_v46 = vsel %vm497_vm4, %v465_v26, %v509_v59  ;;  %v436_v47 = vadd.f32 %v435_v38, %v434_v21  ;;  %v462_v49 = vmul.f32 0.0625, %v382_v25 }
  0xce   :  { %v353_v55 = vadd.f32 %v352_v11, %v351_v5  ;;  %v500_v42 = vsel %vm499_vm5, %v458_v31, %v498_v37  ;;  %v511_v48 = vsel %vm499_vm5, %v466_v34, %v510_v46  ;;  %v467_v50 = vmul.f32 0.0625, %v427_v14 }
  0xcf   :  { %v449_v19 = vrot.slane %v448_v12, 4  ;;  %v445_v56 = vadd.f32 %v444_v43, %v443_v32  ;;  %v468_v58 = vmul.f32 0.0625, %v436_v47 }
  0xd0   :  { %v354_v28 = vrot.slane %v353_v55, 1  ;;  %v512_v57 = vsel %vm501_vm6, %v467_v50, %v511_v48 }
  0xd1   :  { %v450_v7 = vadd.f32 %v449_v19, %v448_v12  ;;  %v513_v61 = vsel %vm503_vm7, %v468_v58, %v512_v57  ;;  %v469_v62 = vmul.f32 0.0625, %v445_v56 }
  0xd2   :  { %v355_v33 = vadd.f32 %v354_v28, %v353_v55 }
  0xd3   :  { %v451_v36 = vrot.slane %v450_v7, 2  ;;  %v514_v63 = vsel %vm505_vm8, %v469_v62, %v513_v61 }
  0xd4   :  { %v459_v39 = vmul.f32 0.0625, %v355_v33 }
  0xd5   :  { %v452_v40 = vadd.f32 %v451_v36, %v450_v7 }
  0xd6   :  { %v502_v44 = vsel %vm501_vm6, %v459_v39, %v500_v42 }
  0xd7   :  { %v453_v45 = vrot.slane %v452_v40, 1  ;;  %v504_v29 = vsel %vm503_vm7, %v460_v13, %v502_v44 }
  0xd8   :  { %v506_v51 = vsel %vm505_vm8, %v461_v41, %v504_v29 }
  0xd9   :  { %v508_v52 = vsel %vm507_vm9, %v462_v49, %v506_v51  ;;  %v454_v53 = vadd.f32 %v453_v45, %v452_v40 }
  0xda   :  { %633 = vmatmul.msk.f32.vlgmr.msrb.gmra.mxu1 %vm310_vm2, %v508_v52 }
  0xdb   :  { %v470_v60 = vmul.f32 0.0625, %v454_v53 }
  0xdd   :  { %v515_v1 = vsel %vm507_vm9, %v470_v60, %v514_v63 }
  0xe2   :  { %634 = vmatmul.msk.f32.gmra.mxu1 %vm310_vm2, %v515_v1 }
 0x157   :  { %v537_v54 = vpop.f32.mrf.mxu1 }
 0x158   :  { %v538_v3 = vadd.f32 %v644_v2, %v537_v54 }
 0x15a   :  { %635 = vmatmul.msk.f32.vlgmr.msrb.gmra.mxu2 %vm310_vm2, %v538_v3 }
 0x15f   :  { %v540_v4 = vpop.f32.mrf.mxu1 }
 0x160   :  { %v541_v5 = vadd.f32 %v644_v2, %v540_v4 }
 0x162   :  { %636 = vmatmul.msk.f32.gmra.mxu2 %vm310_vm2, %v541_v5 }
 0x1dd   :  { %v574_v0 = vpop.f32.mrf.mxu2 }
 0x1de   :  { %v575_v8 = vadd.f32 %v645_v6, %v574_v0 }
 0x1e0   :  { %580 = vst.msk [vmem:[#allocation2] sm:$0xff] %vm310_vm2, %v575_v8 }
 0x1e5   :  { %v577_v35 = vpop.f32.mrf.mxu2 }
 0x1e6   :  { %v578_v9 = vadd.f32 %v645_v6, %v577_v35 }
 0x1e8   :  { %581 = vst.msk [vmem:[#allocation2 + $0x8] sm:$0xff] %vm310_vm2, %v578_v9 }
 0x1e9   :  { %594 = dma.vmem_to_hbm [thread:$0]  %s587_s13, 256, %s589_s15, [#allocation3], %s673_s16, %s673_s16, %s674_s17  }
 0x1ea   :  { %670 = dma.done.wait [#allocation3], 256  }
 0x1eb   :  { %671 = vsyncadd [#allocation3], 4294967040 }
 0x1ec   :  { %599 = vsyncpa [#allocation3], 1 }

</bundles_post_ra>
